<compile_context>
chip_gen: v5e
topology: v5e:2x2
jax: 0.10.0
libtpu: 0.0.40
codegen_flags: <defaults>
</compile_context>

<pallas_src>
import jax
import jax.numpy as jnp
from jax.experimental import pallas as pl
from jax.experimental.pallas import tpu as pltpu

C_HID = 6     # hidden channels of layer1
KW = 5        # conv kernel width
PAD = 2       # circular padding on each side


def _l96_ode_net_kernel(b2_ref,                       # SMEM (1,)
                        u_ref, a_ref, s_ref, vp_ref,  # (TB,N), (N,6N), (6N,N), (3,6N)
                        out_ref):                     # (TB, N)
    u = u_ref[...]                                                    # (TB, N) f32

    # layer1 (circular conv, all 6 channels) as one MXU matmul against the folded
    # weight matrix, then bias + ReLU on the lane-concatenated (TB, 6N) block.
    y = jnp.dot(u, a_ref[...], preferred_element_type=jnp.float32)    # (TB, 6N)
    y = jnp.maximum(y + vp_ref[0:1, :], 0.0)

    # layer2 (1x1 conv over concat([y**2, y])): per-lane scale, then channel-sum
    # folded into a second MXU matmul with the 0/1 selection matrix S.
    z = (y * y) * vp_ref[1:2, :] + y * vp_ref[2:3, :]                  # (TB, 6N)
    out_ref[...] = (jnp.dot(z, s_ref[...], preferred_element_type=jnp.float32)
                    + b2_ref[0])


def _fold_params(w1, b1, w2, n):
    """Fold conv weights into matmul operands (tiny, batch-independent plumbing)."""
    w1k = w1.reshape(C_HID, KW).astype(jnp.float32)
    b1k = b1.reshape(C_HID).astype(jnp.float32)
    w2k = w2.reshape(2 * C_HID).astype(jnp.float32)

    ix = jnp.arange(n)
    # perm[k, j, i] = 1 iff j == (i + k - PAD) mod n
    src = (ix[None, :] + jnp.arange(KW)[:, None] - PAD) % n            # (KW, N)
    perm = (ix[None, :, None] == src[:, None, :]).astype(jnp.float32)  # (KW, N, N)

    # A[j, c*N + i] = sum_k w1[c, k] * [j == (i + k - PAD) mod N]
    a = jnp.einsum('ck,kji->jci', w1k, perm).reshape(n, C_HID * n)     # (N, 6N)
    # S[c*N + j, i] = [j == i]  (channel reduction)
    s = jnp.tile(jnp.eye(n, dtype=jnp.float32), (C_HID, 1))            # (6N, N)
    # per-lane rows: bias, w2 (squared part), w2 (linear part)
    vp = jnp.stack([jnp.repeat(b1k, n),
                    jnp.repeat(w2k[:C_HID], n),
                    jnp.repeat(w2k[C_HID:], n)])                       # (3, 6N)
    return a, s, vp


def _batch_tile(bp):
    # Largest tile <= 2048 rows that still gives >= 2 grid steps (megacore on v7x);
    # otherwise process the whole (already 8-row-aligned) batch in one step.
    for t in (2048, 1024, 512, 256, 128, 64, 32, 16, 8):
        if bp % t == 0 and bp // t >= 2:
            return t
    return bp


@jax.jit
def l96_ode_net_forward(t, u, w1, b1, w2, b2):
    """Pallas implementation of L96_ODE_Net.forward(t, u). t is unused (as in torch)."""
    del t
    bs = u.shape[:-1]
    n = u.shape[-1]
    x = u.reshape(-1, n).astype(jnp.float32)
    b = x.shape[0]

    bp = ((b + 7) // 8) * 8                    # pad batch to a sublane multiple
    if bp != b:
        x = jnp.pad(x, ((0, bp - b), (0, 0)))
    tb = _batch_tile(bp)

    a, s, vp = _fold_params(w1, b1, w2, n)
    b2k = b2.reshape(1).astype(jnp.float32)

    cn = C_HID * n
    flops = 4 * bp * n * cn + 6 * bp * cn + bp * n
    bytes_accessed = 4 * (2 * bp * n + 2 * n * cn + 3 * cn + 1)

    out = pl.pallas_call(
        _l96_ode_net_kernel,
        out_shape=jax.ShapeDtypeStruct((bp, n), jnp.float32),
        grid=(bp // tb,),
        in_specs=[
            pl.BlockSpec(memory_space=pltpu.MemorySpace.SMEM),   # b2 (1,)
            pl.BlockSpec((tb, n), lambda i: (i, 0)),             # u tile
            pl.BlockSpec((n, cn), lambda i: (0, 0)),             # A  (VMEM-resident)
            pl.BlockSpec((cn, n), lambda i: (0, 0)),             # S  (VMEM-resident)
            pl.BlockSpec((3, cn), lambda i: (0, 0)),             # bias/w2 rows (resident)
        ],
        out_specs=pl.BlockSpec((tb, n), lambda i: (i, 0)),
        compiler_params=pltpu.CompilerParams(
            dimension_semantics=("parallel",)),
        cost_estimate=pl.CostEstimate(
            flops=flops, transcendentals=0, bytes_accessed=bytes_accessed),
    )(b2k, x, a, s, vp)

    return out[:b].reshape(*bs, n)


def _reference_forward(t, u, w1, b1, w2, b2):
    """Pure-JAX transcription of the PyTorch forward (for verification)."""
    del t
    bs = u.shape[:-1]
    n = u.shape[-1]
    x = u.reshape(-1, n)
    xp = jnp.concatenate([x[:, n - PAD:], x, x[:, :PAD]], axis=-1)     # circular pad
    out1 = jnp.stack(
        [sum(w1[c, 0, k] * xp[:, k:k + n] for k in range(KW)) + b1[c]
         for c in range(C_HID)], axis=1)                               # (B, 6, n)
    out1 = jnp.maximum(out1, 0.0)
    feat = jnp.concatenate([out1 ** 2, out1], axis=1)                  # (B, 12, n)
    out = jnp.einsum('c,bcn->bn', w2[0, :, 0], feat) + b2[0]
    return out.reshape(*bs, n)


if __name__ == "__main__":
    key = jax.random.PRNGKey(0)
    k_u, k_w1, k_b1, k_w2, k_b2 = jax.random.split(key, 5)

    B, X_DIM = 16, 40                       # classic Lorenz-96 state dimension
    u = jax.random.normal(k_u, (B, X_DIM), dtype=jnp.float32)
    # Parameters in PyTorch Conv1d layouts: (out_ch, in_ch, k)
    w1 = 0.3 * jax.random.normal(k_w1, (C_HID, 1, KW), dtype=jnp.float32)
    b1 = 0.1 * jax.random.normal(k_b1, (C_HID,), dtype=jnp.float32)
    w2 = 0.3 * jax.random.normal(k_w2, (1, 2 * C_HID, 1), dtype=jnp.float32)
    b2 = 0.1 * jax.random.normal(k_b2, (1,), dtype=jnp.float32)
    t = jnp.float32(0.0)

    out = l96_ode_net_forward(t, u, w1, b1, w2, b2)
    out = jax.block_until_ready(out)

    ref = _reference_forward(t, u, w1, b1, w2, b2)
    assert out.shape == (B, X_DIM) and out.dtype == jnp.float32
    max_err = float(jnp.max(jnp.abs(out - ref)))
    assert jnp.allclose(out, ref, rtol=1e-3, atol=1e-3), f"max abs err = {max_err}"
    print("KERNEL_OK")
</pallas_src>

<mosaic_0001>
module attributes {stable_mosaic.version = 11 : i64} {
  func.func @_l96_ode_net_kernel(%arg0: i32, %arg1: memref<1xf32, #tpu.memory_space<smem>>, %arg2: memref<8x40xf32, #tpu.memory_space<vmem>>, %arg3: memref<40x240xf32, #tpu.memory_space<vmem>>, %arg4: memref<240x40xf32, #tpu.memory_space<vmem>>, %arg5: memref<3x240xf32, #tpu.memory_space<vmem>>, %arg6: memref<8x40xf32, #tpu.memory_space<vmem>>) attributes {dimension_semantics = [#tpu.dimension_semantics<parallel>], iteration_bounds = array<i64: 2>, scalar_prefetch = 0 : i64, scratch_operands = 0 : i64, tpu.core_type = #tpu.core_type<tc>, window_params = [{transform_indices = @transform_0, window_bounds = array<i64: 1>}, {transform_indices = @transform_1, window_bounds = array<i64: 8, 40>}, {pipeline_mode = #tpu.pipeline_mode<synchronous>, transform_indices = @transform_2, window_bounds = array<i64: 40, 240>}, {pipeline_mode = #tpu.pipeline_mode<synchronous>, transform_indices = @transform_3, window_bounds = array<i64: 240, 40>}, {pipeline_mode = #tpu.pipeline_mode<synchronous>, transform_indices = @transform_4, window_bounds = array<i64: 3, 240>}, {transform_indices = @transform_5, window_bounds = array<i64: 8, 40>}]} {
    %c0 = arith.constant 0 : index
    %c0_0 = arith.constant 0 : index
    %0 = vector.load %arg2[%c0, %c0_0] : memref<8x40xf32, #tpu.memory_space<vmem>>, vector<8x40xf32>
    %c0_1 = arith.constant 0 : index
    %c0_2 = arith.constant 0 : index
    %1 = vector.load %arg3[%c0_1, %c0_2] : memref<40x240xf32, #tpu.memory_space<vmem>>, vector<40x240xf32>
    %cst = arith.constant dense<0.000000e+00> : vector<8x240xf32>
    %2 = tpu.matmul %0, %1, %cst {dimension_numbers = #tpu.dot_dimension_numbers<[1], [0], [0], [1], [0, 0, 1, 1], [], []>} : vector<8x40xf32>, vector<40x240xf32>, vector<8x240xf32> -> vector<8x240xf32>
    %c0_3 = arith.constant 0 : index
    %c0_4 = arith.constant 0 : index
    %3 = vector.load %arg5[%c0_3, %c0_4] : memref<3x240xf32, #tpu.memory_space<vmem>>, vector<1x240xf32>
    %4 = vector.broadcast %3 : vector<1x240xf32> to vector<8x240xf32>
    %5 = arith.addf %2, %4 : vector<8x240xf32>
    %cst_5 = arith.constant 0.000000e+00 : f32
    %6 = vector.broadcast %cst_5 : f32 to vector<8x240xf32>
    %7 = arith.maximumf %5, %6 : vector<8x240xf32>
    %8 = arith.mulf %7, %7 : vector<8x240xf32>
    %c1 = arith.constant 1 : index
    %c0_6 = arith.constant 0 : index
    %9 = vector.load %arg5[%c1, %c0_6] : memref<3x240xf32, #tpu.memory_space<vmem>>, vector<1x240xf32>
    %10 = vector.broadcast %9 : vector<1x240xf32> to vector<8x240xf32>
    %11 = arith.mulf %8, %10 : vector<8x240xf32>
    %c2 = arith.constant 2 : index
    %c0_7 = arith.constant 0 : index
    %12 = vector.load %arg5[%c2, %c0_7] : memref<3x240xf32, #tpu.memory_space<vmem>>, vector<1x240xf32>
    %13 = vector.broadcast %12 : vector<1x240xf32> to vector<8x240xf32>
    %14 = arith.mulf %7, %13 : vector<8x240xf32>
    %15 = arith.addf %11, %14 : vector<8x240xf32>
    %c0_8 = arith.constant 0 : index
    %c0_9 = arith.constant 0 : index
    %16 = vector.load %arg4[%c0_8, %c0_9] : memref<240x40xf32, #tpu.memory_space<vmem>>, vector<240x40xf32>
    %cst_10 = arith.constant dense<0.000000e+00> : vector<8x40xf32>
    %17 = tpu.matmul %15, %16, %cst_10 {dimension_numbers = #tpu.dot_dimension_numbers<[1], [0], [0], [1], [0, 0, 1, 1], [], []>} : vector<8x240xf32>, vector<240x40xf32>, vector<8x40xf32> -> vector<8x40xf32>
    %c0_11 = arith.constant 0 : index
    %18 = memref.load %arg1[%c0_11] : memref<1xf32, #tpu.memory_space<smem>>
    %19 = vector.broadcast %18 : f32 to vector<8x40xf32>
    %20 = arith.addf %17, %19 : vector<8x40xf32>
    %c0_12 = arith.constant 0 : index
    %c0_13 = arith.constant 0 : index
    %21 = vector.load %arg6[%c0_12, %c0_13] : memref<8x40xf32, #tpu.memory_space<vmem>>, vector<8x40xf32>
    tpu.vector_store %arg6[%c0_12, %c0_13], %20 {strides = array<i32>} : memref<8x40xf32, #tpu.memory_space<vmem>>, vector<8x40xf32>,
    return
  }
  func.func @transform_0(%arg0: i32) -> i32 {
    %c0_i32 = arith.constant 0 : i32
    %c0_i32_0 = arith.constant 0 : i32
    return %c0_i32 : i32
  }
  func.func @transform_1(%arg0: i32) -> (i32, i32) {
    %c0_i32 = arith.constant 0 : i32
    %c0_i32_0 = arith.constant 0 : i32
    return %arg0, %c0_i32 : i32, i32
  }
  func.func @transform_2(%arg0: i32) -> (i32, i32) {
    %c0_i32 = arith.constant 0 : i32
    %c0_i32_0 = arith.constant 0 : i32
    %c0_i32_1 = arith.constant 0 : i32
    return %c0_i32, %c0_i32_0 : i32, i32
  }
  func.func @transform_3(%arg0: i32) -> (i32, i32) {
    %c0_i32 = arith.constant 0 : i32
    %c0_i32_0 = arith.constant 0 : i32
    %c0_i32_1 = arith.constant 0 : i32
    return %c0_i32, %c0_i32_0 : i32, i32
  }
  func.func @transform_4(%arg0: i32) -> (i32, i32) {
    %c0_i32 = arith.constant 0 : i32
    %c0_i32_0 = arith.constant 0 : i32
    %c0_i32_1 = arith.constant 0 : i32
    return %c0_i32, %c0_i32_0 : i32, i32
  }
  func.func @transform_5(%arg0: i32) -> (i32, i32) {
    %c0_i32 = arith.constant 0 : i32
    %c0_i32_0 = arith.constant 0 : i32
    return %arg0, %c0_i32 : i32, i32
  }
}

</mosaic_0001>

<bundles_post_ra>
// kernel: l96_ode_net_forward.1
= control target key start
LH: loop header
LB: loop body
LE: loop exit
PB: predicated region body
PF: predicated region fallthrough
CT: control target
= control target key end

     0   :  { %s826_s0 = inlined_call_operand.<no memory space> [shape: f32[1], index: 0, kind: input, shape index: {}]   ;;  %s827_s1 = inlined_call_operand.vmem [shape: f32[16,40], index: 1, kind: input, shape index: {}]   ;;  %s828_s2 = inlined_call_operand.vmem [shape: f32[40,240], index: 2, kind: input, shape index: {}]   ;;  %s829_s3 = inlined_call_operand.vmem [shape: f32[240,40], index: 3, kind: input, shape index: {}]   ;;  %s830_s4 = inlined_call_operand.vmem [shape: f32[3,240], index: 4, kind: input, shape index: {}]   ;;  %s831_s5 = inlined_call_operand.hbm [shape: f32[16,40], index: 5, kind: output, shape index: {}]  }
   0x1   :  { %10 = sst [smem:[#allocation2]] %s826_s0 }
   0x2   :  { %11 = vsyncpa [#allocation4], 0 }
   0x3   :  { %13 = vsyncpa [#allocation4 + $0x1], 0  ;;  %s609_s20 = smov 0   ;;  %s611_s21 = smov 0  }
   0x4   :  { %s613_s22 = smov 0   ;;  %s615_s23 = smov 0  }
   0x5 LB: > { %s630_s0 = sadd.s32 4294967295, %s574_s23   ;;  %s458_s24 = sadd.s32 4294967294, %s574_s23   ;;  %s574_s23 = sphi %s615_s23, %s837_s23   ;;  %s570_s22 = sphi %s613_s22, %s836_s22   ;;  %s566_s21 = sphi %s611_s21, %s835_s21   ;;  %s562_s20 = sphi %s609_s20, %s834_s20  }
   0x6   : > { %s634_s25 = sadd.s32 1, %s574_s23   ;;  %s136_s26 = sadd.s32 1, %s570_s22 }
   0x7   : > { %s133_s27 = ssub.s32 %s574_s23, %s634_s25  ;;  %p146_p0 = scmp.ne.s32.totalorder %s570_s22, %s566_s21 }
   0x8   : > { %p134_p1 = scmp.eq.s32.totalorder %s133_s27, 0  ;;  %p147_p2 = scmp.eq.s32.totalorder %s630_s0, 1 }
   0x9   : > { %p152_p3 = scmp.ne.s32.totalorder %s566_s21, %s562_s20  ;;  %p153_p4 = scmp.eq.s32.totalorder %s458_s24, 1 }
   0xa   : > { %s645_s28 = scalar_select %p134_p1, %s570_s22, %s136_s26  }
   0xb   : > { %p647_p5 = por %p147_p2, %p146_p0  ;;  %p651_p6 = por %p153_p4, %p152_p3 }
   0xc   : > { %p461_p7 = scmp.ge.s32.totalorder %s574_s23, 1  ;;  %p190_p8 = scmp.lt.s32.totalorder %s574_s23, 3 }
   0xe   : > { %p191_p9 = pnand %p461_p7, %p190_p8 }
   0xf   : > { %p217_p10 = scmp.lt.s32.totalorder (!%p191_p9), %s630_s0, 1  ;;  %s336_s12 = sld [smem:[#allocation2]] (!%p191_p9) }
  0x10   : > { %194 = sbr.rel (%p191_p9) target bundleno = 306 (0x132), region = 40  ;;  %s214_s13 = sand.u32 (!%p191_p9), 1, %s566_s21  }
  0x11   : > { %s462_s14 = sshll.u32 (!%p191_p9), %s214_s13, 3  ;;  %s384_s27 = scalar_lea.sflag (!%p191_p9), [#allocation4], %s214_s13 }
  0x12   : > { %s216_s24 = scalar_lea.vmem (!%p191_p9), [#allocation3], %s462_s14  ;;  %s532_s9 = scalar_lea.hbm (!%p191_p9), %s831_s5, 16 }
  0x15   : > { %v230_v0 = vld [vmem:[%s828_s2 + $0x40] sm:$0xff]  ;;  %v231_v1 = vld [vmem:[%s828_s2 + $0x48] sm:$0xff]  ;;  %v228_v2 = vld [vmem:[%s828_s2 + $0x30] sm:$0xff]  ;;  %s218_s18 = scalar_select %p217_p10, %s630_s0, 1  ;;  %vm238_vm0 = vcmask 326656   ;;  %vm338_vm1 = vcmask 916480  }
  0x16   : > { %253 = vmatpush.msra.mxu0 %v230_v0  ;;  %273 = vmatpush.msra.mxu1 %v231_v1  ;;  %v229_v3 = vld [vmem:[%s828_s2 + $0x38] sm:$0xff]  ;;  %v226_v4 = vld [vmem:[%s828_s2 + $0x20] sm:$0xff]  ;;  %v227_v5 = vld [vmem:[%s828_s2 + $0x28] sm:$0xff]  ;;  %v337_v0 = vstv %s336_s12 }
  0x17   : > { %v321_v6 = vld [vmem:[%s829_s3 + $0x78] sm:$0xff]  ;;  %v320_v7 = vld [vmem:[%s829_s3 + $0x70] sm:$0xff]  ;;  %s463_s10 = sshll.u32 %s218_s18, 3  ;;  %v335_v10 = vld [vmem:[%s829_s3 + $0xe8] sm:$0xff]  ;;  %s396_s18 = sshll.u32 %s216_s24, 4  ;;  %s397_s18 = int_to_ptr.vmem [resolvable:$true] %s396_s18 }
  0x18   : > { %254 = vmatpush.msra.mxu0 %v228_v2  ;;  %274 = vmatpush.msra.mxu1 %v229_v3  ;;  %v224_v8 = vld [vmem:[%s828_s2 + $0x10] sm:$0xff]  ;;  %v225_v9 = vld [vmem:[%s828_s2 + $0x18] sm:$0xff]  ;;  %s220_s15 = scalar_lea.vmem %s827_s1, %s463_s10  ;;  %v319_v11 = vld [vmem:[%s829_s3 + $0x68] sm:$0xff] }
  0x19   : > { %342 = vmatpush.msra.mxu2 %v321_v6  ;;  %v334_v12 = vld [vmem:[%s829_s3 + $0xe0] sm:$0xff]  ;;  %v223_v14 = vld [vmem:[%s828_s2 + $0x8] sm:$0xff]  ;;  %364 = vmatpush.msra.mxu3 %v335_v10  ;;  %v333_v17 = vld [vmem:[%s829_s3 + $0xd8] sm:$0xff] }
  0x1a   : > { %255 = vmatpush.msra.mxu0 %v226_v4  ;;  %275 = vmatpush.msra.mxu1 %v227_v5  ;;  %v222_v13 = vld [vmem:[%s828_s2] sm:$0xff]  ;;  %v317_v18 = vld [vmem:[%s829_s3 + $0x58] sm:$0xff]  ;;  %v332_v19 = vld [vmem:[%s829_s3 + $0xd0] sm:$0xff] }
  0x1b   : > { %343 = vmatpush.msra.mxu2 %v320_v7  ;;  %v221_v15 = vld [vmem:[%s220_s15] sm:$0xff]  ;;  %365 = vmatpush.msra.mxu3 %v334_v12  ;;  %v316_v20 = vld [vmem:[%s829_s3 + $0x50] sm:$0xff]  ;;  %v331_v21 = vld [vmem:[%s829_s3 + $0xc8] sm:$0xff]  ;;  %s470_s15 = sshll.u32 %s630_s0, 3 }
  0x1c   : > { %256 = vmatpush.msra.mxu0 %v224_v8  ;;  %276 = vmatpush.msra.mxu1 %v225_v9  ;;  %v318_v16 = vld [vmem:[%s829_s3 + $0x60] sm:$0xff]  ;;  %v315_v22 = vld [vmem:[%s829_s3 + $0x48] sm:$0xff]  ;;  %v329_v25 = vld [vmem:[%s829_s3 + $0xb8] sm:$0xff]  ;;  %s394_s19 = scalar_lea.hbm %s831_s5, %s470_s15 }
  0x1d   : > { %344 = vmatpush.msra.mxu2 %v319_v11  ;;  %366 = vmatpush.msra.mxu3 %v333_v17  ;;  %v330_v23 = vld [vmem:[%s829_s3 + $0xc0] sm:$0xff]  ;;  %v313_v26 = vld [vmem:[%s829_s3 + $0x38] sm:$0xff]  ;;  %v328_v27 = vld [vmem:[%s829_s3 + $0xb0] sm:$0xff]  ;;  %s398_s26 = sshll.u32 %s394_s19, 4  ;;  %s399_s26 = int_to_ptr.hbm [resolvable:$true] %s398_s26 }
  0x1e   : > { %257 = vmatpush.msra.mxu0 %v222_v13  ;;  %277 = vmatpush.msra.mxu1 %v223_v14  ;;  %v314_v24 = vld [vmem:[%s829_s3 + $0x40] sm:$0xff]  ;;  %v312_v28 = vld [vmem:[%s829_s3 + $0x30] sm:$0xff]  ;;  %v311_v29 = vld [vmem:[%s829_s3 + $0x28] sm:$0xff]  ;;  %s526_s6 = sshra.s32 %s399_s26, 4  ;;  %s527_s6 = int_to_ptr.hbm [resolvable:$true] %s526_s6 }
  0x1f   : > { %464 = vmatmul.msk.f32.vlgmr.msra.gmra.mxu0 %vm238_vm0, %v221_v15  ;;  %465 = vmatmul.msk.f32.vlgmr.msra.gmra.mxu1 %vm238_vm0, %v221_v15  ;;  %v327_v30 = vld [vmem:[%s829_s3 + $0xa8] sm:$0xff]  ;;  %v310_v31 = vld [vmem:[%s829_s3 + $0x20] sm:$0xff]  ;;  %v309_v33 = vld [vmem:[%s829_s3 + $0x18] sm:$0xff]  ;;  %s528_s0 = scalar_lea.hbm %s527_s6, 8  ;;  %p533_p0 = scmp.lt.s32.totalorder %s527_s6, %s831_s5 }
  0x20   : > { %345 = vmatpush.msra.mxu2 %v318_v16  ;;  %367 = vmatpush.msra.mxu3 %v332_v19  ;;  %v326_v32 = vld [vmem:[%s829_s3 + $0xa0] sm:$0xff]  ;;  %v325_v34 = vld [vmem:[%s829_s3 + $0x98] sm:$0xff]  ;;  %v308_v35 = vld [vmem:[%s829_s3 + $0x10] sm:$0xff]  ;;  %p529_p11 = scmp.ne.s32.totalorder %s527_s6, %s528_s0  ;;  %p534_p1 = scmp.lt.s32.totalorder %s532_s9, %s528_s0 }
  0x21   : > { %v324_v36 = vld [vmem:[%s829_s3 + $0x90] sm:$0xff]  ;;  %v307_v37 = vld [vmem:[%s829_s3 + $0x8] sm:$0xff]  ;;  %v306_v39 = vld [vmem:[%s829_s3] sm:$0xff] }
  0x22   : > { %346 = vmatpush.msra.mxu2 %v317_v18  ;;  %368 = vmatpush.msra.mxu3 %v331_v21  ;;  %v323_v38 = vld [vmem:[%s829_s3 + $0x88] sm:$0xff]  ;;  %v322_v40 = vld [vmem:[%s829_s3 + $0x80] sm:$0xff]  ;;  %p530_p12 = pnand %p529_p11, %p647_p5  ;;  %p535_p2 = por %p534_p1, %p533_p0 }
  0x23   : > { %v232_v41 = vld [vmem:[%s830_s4] ss:$4 sm:$0x3]  ;;  %v467_v44 = vld [vmem:[%s830_s4 + $0x2] ss:$4 sm:$0x3] }
  0x24   : > { %347 = vmatpush.msra.mxu2 %v316_v20  ;;  %369 = vmatpush.msra.mxu3 %v330_v23  ;;  %v234_v42 = vperm.slane %v232_v41, 0  ;;  %v235_v43 = vperm.slane %v232_v41, 1  ;;  %v466_v47 = vld [vmem:[%s830_s4 + $0x1] ss:$4 sm:$0x3]  ;;  %v299_v50 = vperm.slane %v467_v44, 1  ;;  %p531_p13 = pneg %p530_p12 }
  0x25   : > { %v298_v51 = vperm.slane %v467_v44, 0  ;;  %v290_v54 = vperm.slane %v466_v47, 1  ;;  %v289_v55 = vperm.slane %v466_v47, 0 }
  0x26   : > { %348 = vmatpush.msra.mxu2 %v315_v22  ;;  %370 = vmatpush.msra.mxu3 %v329_v25  ;;  %p536_p3 = pnand %p535_p2, %p531_p13 }
  0x28   : > { %349 = vmatpush.msra.mxu2 %v314_v24  ;;  %371 = vmatpush.msra.mxu3 %v328_v27 }
  0x2a   : > { %350 = vmatpush.msra.mxu2 %v313_v26  ;;  %372 = vmatpush.msra.mxu3 %v327_v30 }
  0x2c   : > { %351 = vmatpush.msra.mxu2 %v312_v28  ;;  %373 = vmatpush.msra.mxu3 %v326_v32 }
  0x2e   : > { %352 = vmatpush.msra.mxu2 %v311_v29  ;;  %374 = vmatpush.msra.mxu3 %v325_v34 }
  0x30   : > { %353 = vmatpush.msra.mxu2 %v310_v31  ;;  %375 = vmatpush.msra.mxu3 %v324_v36 }
  0x32   : > { %354 = vmatpush.msra.mxu2 %v309_v33  ;;  %376 = vmatpush.msra.mxu3 %v323_v38 }
  0x34   : > { %355 = vmatpush.msra.mxu2 %v308_v35  ;;  %377 = vmatpush.msra.mxu3 %v322_v40 }
  0x36   : > { %356 = vmatpush.msra.mxu2 %v307_v37 }
  0x38   : > { %357 = vmatpush.msra.mxu2 %v306_v39 }
  0x9c   : > { %v259_v45 = vpop.f32.mrf.mxu0  ;;  %v279_v46 = vpop.f32.mrf.mxu1 }
  0x9d   : > { %v260_v48 = vadd.f32 %v259_v45, %v234_v42  ;;  %v280_v49 = vadd.f32 %v279_v46, %v235_v43 }
  0x9f   : > { %v282_v52 = vmax.f32 %v260_v48, 0.0  ;;  %v283_v53 = vmax.f32 %v280_v49, 0.0 }
  0xa1   : > { %v284_v56 = vmul.f32 %v282_v52, %v282_v52  ;;  %v285_v57 = vmul.f32 %v283_v53, %v283_v53  ;;  %v303_v58 = vmul.f32 %v299_v50, %v283_v53  ;;  %v302_v59 = vmul.f32 %v298_v51, %v282_v52 }
  0xa3   : > { %v294_v60 = vmul.f32 %v290_v54, %v285_v57  ;;  %v293_v61 = vmul.f32 %v289_v55, %v284_v56 }
  0xa5   : > { %v304_v62 = vadd.f32 %v302_v59, %v293_v61  ;;  %v305_v63 = vadd.f32 %v303_v58, %v294_v60 }
  0xa7   : > { %358 = vmatmul.f32.vlgmr.msra.gmra.mxu2 %v304_v62  ;;  %468 = vmatmul.msk.f32.vlgmr.msra.gmra.mxu3 %vm338_vm1, %v305_v63 }
 0x12a   : > { %v359_v1 = vpop.f32.mrf.mxu2  ;;  %v379_v3 = vpop.f32.mrf.mxu3 }
 0x12b   : > { %v360_v2 = vadd.f32 %v359_v1, %v337_v0 }
 0x12d   : > { %v380_v4 = vadd.f32 %v379_v3, %v360_v2 }
 0x12f   : > { %382 = vst.msk [vmem:[%s216_s24] sm:$0xff] %vm238_vm0, %v380_v4 }
 0x130   : > { %539 = shalt.err (!%p536_p3)
}
 0x131   : > { %473 = dma.vmem_to_hbm [thread:$0]  (%p647_p5), %s397_s18, 128, %s399_s26, %s384_s27  }
 0x132 PF: > { %p479_p4 = scmp.ge.s32.totalorder %s574_s23, 2  ;;  %s410_s12 = sand.u32 1, %s562_s20  }
 0x133   : > { %s411_s13 = scalar_lea.sflag [#allocation4], %s410_s12 }
 0x134   : > { %p476_p7 = pnand %p479_p4, %p651_p6 }
 0x136   : > { %p477_p8 = pneg %p476_p7 }
 0x138   : > { %557 = dma.done.wait (%p477_p8), %s411_s13, 128  }
 0x139   : > { %559 = vsyncadd (%p477_p8), %s411_s13, 4294967168  ;;  %p16_p9 = scmp.ge.s32.totalorder %s634_s25, 4   ;;  %s834_s20 = smov %s566_s21 }
 0x13a   : > { %s835_s21 = smov %s570_s22  ;;  %s836_s22 = smov %s645_s28 }
 0x13b   : > { %s837_s23 = smov %s634_s25  ;;  %18 = sbr.rel (!%p16_p9) target bundleno = 5 (0x5), region = 77 }
 0x140   :  { %417 = vsyncpa [#allocation4], 1 }
 0x141   :  { %419 = vsyncpa [#allocation4 + $0x1], 1 }

</bundles_post_ra>
